<compile_context>
chip_gen: v7x
topology: tpu7x:2x2x1
jax: 0.10.0
libtpu: 0.0.40
codegen_flags: <defaults>
</compile_context>

<pallas_src>
import math

import jax
import jax.numpy as jnp
import numpy as np
from jax.experimental import pallas as pl
from jax.experimental.pallas import tpu as pltpu


def alibi_slopes_np(n_heads: int) -> np.ndarray:
    """Deterministic ALiBi slopes, mirroring the PyTorch helper."""
    closest_power_of_2 = 2 ** math.floor(math.log2(n_heads))
    base = 2.0 ** (-(2.0 ** (-(math.log2(closest_power_of_2) - 3.0))))
    powers = np.arange(1, 1 + closest_power_of_2, dtype=np.float32)
    slopes = np.power(np.float32(base), powers)
    if closest_power_of_2 != n_heads:
        extra_base = 2.0 ** (-(2.0 ** (-(math.log2(2 * closest_power_of_2) - 3.0))))
        n_remains = min(closest_power_of_2, n_heads - closest_power_of_2)
        extra_powers = np.arange(1, 1 + 2 * n_remains, 2, dtype=np.float32)
        slopes = np.concatenate([slopes, np.power(np.float32(extra_base), extra_powers)])
    return slopes.astype(np.float32)


def _alibi_kernel(slopes_sref, mask_ref, out_ref, idx_ref):
    # slopes_sref: (H,)       f32 in SMEM (scalar prefetch)
    # mask_ref:    (TB, S)    VMEM tile of the attention mask (resident across head tiles)
    # out_ref:     (TB, TH*S) lane-dense bias block
    # idx_ref:     (TB, S)    f32 VMEM scratch: (cumsum(mask)-1)*mask, computed once
    #                         per batch tile (head axis is innermost / "arbitrary").
    j = pl.program_id(1)
    tb, s = mask_ref.shape
    th = out_ref.shape[1] // s

    @pl.when(j == 0)
    def _():
        m = mask_ref[...].astype(jnp.float32)
        # Inclusive prefix sum along lanes: ceil(log2(S))-step Hillis-Steele scan.
        # pltpu.roll is a circular lane rotation (XLU); the (1,S) iota mask zeroes
        # wrapped lanes and keeps vreg pressure low.  Exact f32 accumulation.
        lane = jax.lax.broadcasted_iota(jnp.int32, (1, s), 1)
        cs = m
        d = 1
        while d < s:
            shifted = pltpu.roll(cs, d, axis=1)          # shifted[:, k] = cs[:, k - d] (circular)
            cs = cs + jnp.where(lane >= d, shifted, 0.0)
            d *= 2
        idx_ref[...] = (cs - 1.0) * m

    indexes = idx_ref[...]                               # (TB, S) f32
    for hh in range(th):                                 # static unroll, TH is small
        slope = slopes_sref[j * th + hh]                 # scalar splat from SMEM
        out_ref[:, hh * s:(hh + 1) * s] = (indexes * slope).astype(out_ref.dtype)


def _pick_tiles(b: int, h: int, s: int, out_itemsize: int,
                block_budget_bytes: int = 12 * 1024 * 1024):
    """Pick (batch_tile, head_tile) so the (TB, TH*S) output block is ~12 MiB."""
    # Head tile: largest divisor of h such that an 8-row output block fits the budget.
    th = h
    while th > 1 and 8 * th * s * out_itemsize > block_budget_bytes:
        nxt = th - 1
        while nxt > 1 and h % nxt != 0:
            nxt -= 1
        th = nxt

    row_bytes = max(1, th * s * out_itemsize)
    tb = max(1, block_budget_bytes // row_bytes)
    if b >= 16:
        # Guarantee >= 2 batch tiles so the "parallel" batch axis can shard across
        # both TensorCores on v7x (costs nothing on single-TC v5e/v6e).
        tb = min(tb, b // 2)
    tb = min(tb, b)
    if tb < b:
        # Second-to-last dim of a block must be a multiple of 8 unless it equals
        # the full extent.
        tb = max(8, (tb // 8) * 8)
        tb = min(tb, b)
    return tb, th


def alibi_forward(attention_mask: jax.Array, slopes: jax.Array, n_heads: int,
                  out_dtype=jnp.float32) -> jax.Array:
    """attention_mask: (B, S). slopes: (n_heads,) or (n_heads, 1).
    Returns (B, n_heads, 1, S) of `out_dtype` (f32 exact; bf16 halves HBM writes)."""
    b, s = attention_mask.shape
    h = n_heads

    # Keep the mask in a 32-bit dtype so its block has no sublane-packing
    # constraints; the f32 cast happens inside the kernel.
    if attention_mask.dtype.itemsize < 4:
        mask = attention_mask.astype(jnp.int32)
    else:
        mask = attention_mask
    slopes_vec = slopes.reshape(h).astype(jnp.float32)

    out_itemsize = jnp.dtype(out_dtype).itemsize
    tb, th = _pick_tiles(b, h, s, out_itemsize)
    grid = (pl.cdiv(b, tb), h // th)

    # Explicit VMEM budget: double-buffered output + mask blocks + scan scratch.
    out_block_bytes = tb * th * s * out_itemsize
    mask_block_bytes = tb * s * np.dtype(mask.dtype).itemsize
    scratch_bytes = tb * s * 4
    vmem_bytes = 2 * out_block_bytes + 2 * mask_block_bytes + scratch_bytes + (4 << 20)
    vmem_bytes = int(min(vmem_bytes, 56 << 20))

    out = pl.pallas_call(
        _alibi_kernel,
        out_shape=jax.ShapeDtypeStruct((b, h * s), out_dtype),
        grid_spec=pltpu.PrefetchScalarGridSpec(
            num_scalar_prefetch=1,                       # slopes -> SMEM
            grid=grid,
            in_specs=[
                # Mask tile depends only on the batch-tile index -> stays resident
                # (not re-DMA'd) across the inner head-tile axis.
                pl.BlockSpec((tb, s), lambda i, j, slopes_ref: (i, 0)),
            ],
            out_specs=pl.BlockSpec((tb, th * s), lambda i, j, slopes_ref: (i, j)),
            scratch_shapes=[pltpu.VMEM((tb, s), jnp.float32)],
        ),
        compiler_params=pltpu.CompilerParams(
            dimension_semantics=("parallel", "arbitrary"),
            vmem_limit_bytes=vmem_bytes,
        ),
    )(slopes_vec, mask)

    return out.reshape(b, h, 1, s)


def alibi_reference(attention_mask: jax.Array, slopes: jax.Array, n_heads: int) -> jax.Array:
    """Pure-JAX reference matching the PyTorch module."""
    m = attention_mask.astype(jnp.float32)
    indexes = ((jnp.cumsum(m, axis=-1) - 1.0) * m)[:, None, :]          # (B, 1, S)
    alibi = slopes.reshape(n_heads, 1).astype(jnp.float32) * indexes    # (B, H, S)
    b, s = attention_mask.shape
    return alibi.reshape(b, n_heads, 1, s)


# TODO(synk): the PyTorch module's cached `pos_embed` buffer (skip recompute when the
# mask is fixed) is host-side state and is intentionally not replicated in-kernel.

if __name__ == "__main__":
    def _check(b, s, n_heads):
        slopes = jnp.asarray(alibi_slopes_np(n_heads))                       # (H,)
        key = jax.random.PRNGKey(0)
        lengths = jax.random.randint(key, (b,), minval=max(1, s // 2), maxval=s + 1)
        pos = jnp.arange(s)[None, :]
        attention_mask = (pos < lengths[:, None]).astype(jnp.float32)        # (B, S)

        out = jax.block_until_ready(alibi_forward(attention_mask, slopes, n_heads))
        ref = alibi_reference(attention_mask, slopes, n_heads)
        assert out.shape == (b, n_heads, 1, s), out.shape
        np.testing.assert_allclose(np.asarray(out), np.asarray(ref), rtol=1e-5, atol=1e-5)

    _check(2, 128, 8)    # basic small config
    _check(3, 256, 6)    # n_heads not a power of two / not a multiple of 8 (lane-dense path)
    print("KERNEL_OK")
</pallas_src>

<mosaic_0001>
module attributes {stable_mosaic.version = 11 : i64} {
  func.func @_alibi_kernel(%arg0: i32, %arg1: i32, %arg2: memref<8xf32, #tpu.memory_space<smem>>, %arg3: memref<2x128xf32, #tpu.memory_space<vmem>>, %arg4: memref<2x1024xf32, #tpu.memory_space<vmem>>, %arg5: memref<2x128xf32, #tpu.memory_space<vmem>>) attributes {dimension_semantics = [#tpu.dimension_semantics<parallel>, #tpu.dimension_semantics<arbitrary>], iteration_bounds = array<i64: 1, 1>, scalar_prefetch = 1 : i64, scratch_operands = 1 : i64, tpu.core_type = #tpu.core_type<tc>, window_params = [{transform_indices = @transform_0, window_bounds = array<i64: 2, 128>}, {transform_indices = @transform_1, window_bounds = array<i64: 2, 1024>}]} {
    %c0_i32 = arith.constant 0 : i32
    %0 = arith.cmpi eq, %arg1, %c0_i32 : i32
    %1 = arith.extui %0 : i1 to i32
    %c0_i32_0 = arith.constant 0 : i32
    %2 = arith.cmpi ne, %1, %c0_i32_0 : i32
    scf.if %2 {
      %c0_19 = arith.constant 0 : index
      %c0_20 = arith.constant 0 : index
      %60 = vector.load %arg3[%c0_19, %c0_20] : memref<2x128xf32, #tpu.memory_space<vmem>>, vector<2x128xf32>
      %61 = tpu.iota {dimensions = array<i32: 1>} : vector<1x128xi32>
      %c1_i32_21 = arith.constant 1 : i32
      %62 = tpu.dynamic_rotate %60 by %c1_i32_21 dim 1 : vector<2x128xf32>, i32 -> vector<2x128xf32>
      %c1_i32_22 = arith.constant 1 : i32
      %63 = vector.broadcast %c1_i32_22 : i32 to vector<1x128xi32>
      %64 = arith.cmpi sge, %61, %63 : vector<1x128xi32>
      %cst = arith.constant 0.000000e+00 : f32
      %65 = vector.shape_cast %64 : vector<1x128xi1> to vector<1x128xi1>
      %66 = vector.broadcast %65 : vector<1x128xi1> to vector<2x128xi1>
      %67 = vector.broadcast %cst : f32 to vector<2x128xf32>
      %68 = arith.select %66, %62, %67 : vector<2x128xi1>, vector<2x128xf32>
      %69 = arith.addf %60, %68 : vector<2x128xf32>
      %c2_i32_23 = arith.constant 2 : i32
      %70 = tpu.dynamic_rotate %69 by %c2_i32_23 dim 1 : vector<2x128xf32>, i32 -> vector<2x128xf32>
      %c2_i32_24 = arith.constant 2 : i32
      %71 = vector.broadcast %c2_i32_24 : i32 to vector<1x128xi32>
      %72 = arith.cmpi sge, %61, %71 : vector<1x128xi32>
      %cst_25 = arith.constant 0.000000e+00 : f32
      %73 = vector.shape_cast %72 : vector<1x128xi1> to vector<1x128xi1>
      %74 = vector.broadcast %73 : vector<1x128xi1> to vector<2x128xi1>
      %75 = vector.broadcast %cst_25 : f32 to vector<2x128xf32>
      %76 = arith.select %74, %70, %75 : vector<2x128xi1>, vector<2x128xf32>
      %77 = arith.addf %69, %76 : vector<2x128xf32>
      %c4_i32_26 = arith.constant 4 : i32
      %78 = tpu.dynamic_rotate %77 by %c4_i32_26 dim 1 : vector<2x128xf32>, i32 -> vector<2x128xf32>
      %c4_i32_27 = arith.constant 4 : i32
      %79 = vector.broadcast %c4_i32_27 : i32 to vector<1x128xi32>
      %80 = arith.cmpi sge, %61, %79 : vector<1x128xi32>
      %cst_28 = arith.constant 0.000000e+00 : f32
      %81 = vector.shape_cast %80 : vector<1x128xi1> to vector<1x128xi1>
      %82 = vector.broadcast %81 : vector<1x128xi1> to vector<2x128xi1>
      %83 = vector.broadcast %cst_28 : f32 to vector<2x128xf32>
      %84 = arith.select %82, %78, %83 : vector<2x128xi1>, vector<2x128xf32>
      %85 = arith.addf %77, %84 : vector<2x128xf32>
      %c8_i32_29 = arith.constant 8 : i32
      %86 = tpu.dynamic_rotate %85 by %c8_i32_29 dim 1 : vector<2x128xf32>, i32 -> vector<2x128xf32>
      %c8_i32_30 = arith.constant 8 : i32
      %87 = vector.broadcast %c8_i32_30 : i32 to vector<1x128xi32>
      %88 = arith.cmpi sge, %61, %87 : vector<1x128xi32>
      %cst_31 = arith.constant 0.000000e+00 : f32
      %89 = vector.shape_cast %88 : vector<1x128xi1> to vector<1x128xi1>
      %90 = vector.broadcast %89 : vector<1x128xi1> to vector<2x128xi1>
      %91 = vector.broadcast %cst_31 : f32 to vector<2x128xf32>
      %92 = arith.select %90, %86, %91 : vector<2x128xi1>, vector<2x128xf32>
      %93 = arith.addf %85, %92 : vector<2x128xf32>
      %c16_i32 = arith.constant 16 : i32
      %94 = tpu.dynamic_rotate %93 by %c16_i32 dim 1 : vector<2x128xf32>, i32 -> vector<2x128xf32>
      %c16_i32_32 = arith.constant 16 : i32
      %95 = vector.broadcast %c16_i32_32 : i32 to vector<1x128xi32>
      %96 = arith.cmpi sge, %61, %95 : vector<1x128xi32>
      %cst_33 = arith.constant 0.000000e+00 : f32
      %97 = vector.shape_cast %96 : vector<1x128xi1> to vector<1x128xi1>
      %98 = vector.broadcast %97 : vector<1x128xi1> to vector<2x128xi1>
      %99 = vector.broadcast %cst_33 : f32 to vector<2x128xf32>
      %100 = arith.select %98, %94, %99 : vector<2x128xi1>, vector<2x128xf32>
      %101 = arith.addf %93, %100 : vector<2x128xf32>
      %c32_i32 = arith.constant 32 : i32
      %102 = tpu.dynamic_rotate %101 by %c32_i32 dim 1 : vector<2x128xf32>, i32 -> vector<2x128xf32>
      %c32_i32_34 = arith.constant 32 : i32
      %103 = vector.broadcast %c32_i32_34 : i32 to vector<1x128xi32>
      %104 = arith.cmpi sge, %61, %103 : vector<1x128xi32>
      %cst_35 = arith.constant 0.000000e+00 : f32
      %105 = vector.shape_cast %104 : vector<1x128xi1> to vector<1x128xi1>
      %106 = vector.broadcast %105 : vector<1x128xi1> to vector<2x128xi1>
      %107 = vector.broadcast %cst_35 : f32 to vector<2x128xf32>
      %108 = arith.select %106, %102, %107 : vector<2x128xi1>, vector<2x128xf32>
      %109 = arith.addf %101, %108 : vector<2x128xf32>
      %c64_i32 = arith.constant 64 : i32
      %110 = tpu.dynamic_rotate %109 by %c64_i32 dim 1 : vector<2x128xf32>, i32 -> vector<2x128xf32>
      %c64_i32_36 = arith.constant 64 : i32
      %111 = vector.broadcast %c64_i32_36 : i32 to vector<1x128xi32>
      %112 = arith.cmpi sge, %61, %111 : vector<1x128xi32>
      %cst_37 = arith.constant 0.000000e+00 : f32
      %113 = vector.shape_cast %112 : vector<1x128xi1> to vector<1x128xi1>
      %114 = vector.broadcast %113 : vector<1x128xi1> to vector<2x128xi1>
      %115 = vector.broadcast %cst_37 : f32 to vector<2x128xf32>
      %116 = arith.select %114, %110, %115 : vector<2x128xi1>, vector<2x128xf32>
      %117 = arith.addf %109, %116 : vector<2x128xf32>
      %cst_38 = arith.constant 1.000000e+00 : f32
      %118 = vector.broadcast %cst_38 : f32 to vector<2x128xf32>
      %119 = arith.subf %117, %118 : vector<2x128xf32>
      %120 = arith.mulf %119, %60 : vector<2x128xf32>
      %c0_39 = arith.constant 0 : index
      %c0_40 = arith.constant 0 : index
      %121 = vector.load %arg5[%c0_39, %c0_40] : memref<2x128xf32, #tpu.memory_space<vmem>>, vector<2x128xf32>
      tpu.vector_store %arg5[%c0_39, %c0_40], %120 {strides = array<i32>} : memref<2x128xf32, #tpu.memory_space<vmem>>, vector<2x128xf32>,
    } else {
    }
    %c0 = arith.constant 0 : index
    %c0_1 = arith.constant 0 : index
    %3 = vector.load %arg5[%c0, %c0_1] : memref<2x128xf32, #tpu.memory_space<vmem>>, vector<2x128xf32>
    %c8_i32 = arith.constant 8 : i32
    %4 = arith.muli %arg1, %c8_i32 : i32
    %c0_i32_2 = arith.constant 0 : i32
    %5 = arith.addi %4, %c0_i32_2 : i32
    %6 = arith.index_cast %5 : i32 to index
    %7 = memref.load %arg2[%6] : memref<8xf32, #tpu.memory_space<smem>>
    %8 = vector.broadcast %7 : f32 to vector<2x128xf32>
    %9 = arith.mulf %3, %8 : vector<2x128xf32>
    %c0_3 = arith.constant 0 : index
    %c0_4 = arith.constant 0 : index
    %10 = vector.load %arg4[%c0_3, %c0_4] : memref<2x1024xf32, #tpu.memory_space<vmem>>, vector<2x128xf32>
    tpu.vector_store %arg4[%c0_3, %c0_4], %9 {strides = array<i32>} : memref<2x1024xf32, #tpu.memory_space<vmem>>, vector<2x128xf32>,
    %c8_i32_5 = arith.constant 8 : i32
    %11 = arith.muli %arg1, %c8_i32_5 : i32
    %c1_i32 = arith.constant 1 : i32
    %12 = arith.addi %11, %c1_i32 : i32
    %13 = arith.index_cast %12 : i32 to index
    %14 = memref.load %arg2[%13] : memref<8xf32, #tpu.memory_space<smem>>
    %15 = vector.broadcast %14 : f32 to vector<2x128xf32>
    %16 = arith.mulf %3, %15 : vector<2x128xf32>
    %c0_6 = arith.constant 0 : index
    %c128 = arith.constant 128 : index
    %17 = vector.load %arg4[%c0_6, %c128] : memref<2x1024xf32, #tpu.memory_space<vmem>>, vector<2x128xf32>
    tpu.vector_store %arg4[%c0_6, %c128], %16 {strides = array<i32>} : memref<2x1024xf32, #tpu.memory_space<vmem>>, vector<2x128xf32>,
    %c8_i32_7 = arith.constant 8 : i32
    %18 = arith.muli %arg1, %c8_i32_7 : i32
    %c2_i32 = arith.constant 2 : i32
    %19 = arith.addi %18, %c2_i32 : i32
    %20 = arith.index_cast %19 : i32 to index
    %21 = memref.load %arg2[%20] : memref<8xf32, #tpu.memory_space<smem>>
    %22 = vector.broadcast %21 : f32 to vector<2x128xf32>
    %23 = arith.mulf %3, %22 : vector<2x128xf32>
    %c0_8 = arith.constant 0 : index
    %c256 = arith.constant 256 : index
    %24 = vector.load %arg4[%c0_8, %c256] : memref<2x1024xf32, #tpu.memory_space<vmem>>, vector<2x128xf32>
    tpu.vector_store %arg4[%c0_8, %c256], %23 {strides = array<i32>} : memref<2x1024xf32, #tpu.memory_space<vmem>>, vector<2x128xf32>,
    %c8_i32_9 = arith.constant 8 : i32
    %25 = arith.muli %arg1, %c8_i32_9 : i32
    %c3_i32 = arith.constant 3 : i32
    %26 = arith.addi %25, %c3_i32 : i32
    %27 = arith.index_cast %26 : i32 to index
    %28 = memref.load %arg2[%27] : memref<8xf32, #tpu.memory_space<smem>>
    %29 = vector.broadcast %28 : f32 to vector<2x128xf32>
    %30 = arith.mulf %3, %29 : vector<2x128xf32>
    %c0_10 = arith.constant 0 : index
    %c384 = arith.constant 384 : index
    %31 = vector.load %arg4[%c0_10, %c384] : memref<2x1024xf32, #tpu.memory_space<vmem>>, vector<2x128xf32>
    tpu.vector_store %arg4[%c0_10, %c384], %30 {strides = array<i32>} : memref<2x1024xf32, #tpu.memory_space<vmem>>, vector<2x128xf32>,
    %c8_i32_11 = arith.constant 8 : i32
    %32 = arith.muli %arg1, %c8_i32_11 : i32
    %c4_i32 = arith.constant 4 : i32
    %33 = arith.addi %32, %c4_i32 : i32
    %34 = arith.index_cast %33 : i32 to index
    %35 = memref.load %arg2[%34] : memref<8xf32, #tpu.memory_space<smem>>
    %36 = vector.broadcast %35 : f32 to vector<2x128xf32>
    %37 = arith.mulf %3, %36 : vector<2x128xf32>
    %c0_12 = arith.constant 0 : index
    %c512 = arith.constant 512 : index
    %38 = vector.load %arg4[%c0_12, %c512] : memref<2x1024xf32, #tpu.memory_space<vmem>>, vector<2x128xf32>
    tpu.vector_store %arg4[%c0_12, %c512], %37 {strides = array<i32>} : memref<2x1024xf32, #tpu.memory_space<vmem>>, vector<2x128xf32>,
    %c8_i32_13 = arith.constant 8 : i32
    %39 = arith.muli %arg1, %c8_i32_13 : i32
    %c5_i32 = arith.constant 5 : i32
    %40 = arith.addi %39, %c5_i32 : i32
    %41 = arith.index_cast %40 : i32 to index
    %42 = memref.load %arg2[%41] : memref<8xf32, #tpu.memory_space<smem>>
    %43 = vector.broadcast %42 : f32 to vector<2x128xf32>
    %44 = arith.mulf %3, %43 : vector<2x128xf32>
    %c0_14 = arith.constant 0 : index
    %c640 = arith.constant 640 : index
    %45 = vector.load %arg4[%c0_14, %c640] : memref<2x1024xf32, #tpu.memory_space<vmem>>, vector<2x128xf32>
    tpu.vector_store %arg4[%c0_14, %c640], %44 {strides = array<i32>} : memref<2x1024xf32, #tpu.memory_space<vmem>>, vector<2x128xf32>,
    %c8_i32_15 = arith.constant 8 : i32
    %46 = arith.muli %arg1, %c8_i32_15 : i32
    %c6_i32 = arith.constant 6 : i32
    %47 = arith.addi %46, %c6_i32 : i32
    %48 = arith.index_cast %47 : i32 to index
    %49 = memref.load %arg2[%48] : memref<8xf32, #tpu.memory_space<smem>>
    %50 = vector.broadcast %49 : f32 to vector<2x128xf32>
    %51 = arith.mulf %3, %50 : vector<2x128xf32>
    %c0_16 = arith.constant 0 : index
    %c768 = arith.constant 768 : index
    %52 = vector.load %arg4[%c0_16, %c768] : memref<2x1024xf32, #tpu.memory_space<vmem>>, vector<2x128xf32>
    tpu.vector_store %arg4[%c0_16, %c768], %51 {strides = array<i32>} : memref<2x1024xf32, #tpu.memory_space<vmem>>, vector<2x128xf32>,
    %c8_i32_17 = arith.constant 8 : i32
    %53 = arith.muli %arg1, %c8_i32_17 : i32
    %c7_i32 = arith.constant 7 : i32
    %54 = arith.addi %53, %c7_i32 : i32
    %55 = arith.index_cast %54 : i32 to index
    %56 = memref.load %arg2[%55] : memref<8xf32, #tpu.memory_space<smem>>
    %57 = vector.broadcast %56 : f32 to vector<2x128xf32>
    %58 = arith.mulf %3, %57 : vector<2x128xf32>
    %c0_18 = arith.constant 0 : index
    %c896 = arith.constant 896 : index
    %59 = vector.load %arg4[%c0_18, %c896] : memref<2x1024xf32, #tpu.memory_space<vmem>>, vector<2x128xf32>
    tpu.vector_store %arg4[%c0_18, %c896], %58 {strides = array<i32>} : memref<2x1024xf32, #tpu.memory_space<vmem>>, vector<2x128xf32>,
    return
  }
  func.func @transform_0(%arg0: i32, %arg1: i32, %arg2: memref<8xf32, #tpu.memory_space<smem>>) -> (i32, i32) {
    %c0_i32 = arith.constant 0 : i32
    %c0_i32_0 = arith.constant 0 : i32
    return %arg0, %c0_i32 : i32, i32
  }
  func.func @transform_1(%arg0: i32, %arg1: i32, %arg2: memref<8xf32, #tpu.memory_space<smem>>) -> (i32, i32) {
    %c0_i32 = arith.constant 0 : i32
    return %arg0, %arg1 : i32, i32
  }
}

</mosaic_0001>

<bundles_post_ra>
// kernel: tpu_custom_call.1
= control target key start
LH: loop header
LB: loop body
LE: loop exit
PB: predicated region body
PF: predicated region fallthrough
CT: control target
= control target key end

     0   :  { %s232_s0 = inlined_call_operand.hbm [shape: f32[8], index: 0, kind: input, shape index: {}]   ;;  %s233_s1 = inlined_call_operand.vmem [shape: f32[2,128], index: 1, kind: input, shape index: {}]   ;;  %s234_s2 = inlined_call_operand.hbm [shape: f32[2,1024], index: 2, kind: output, shape index: {}]  }
   0x1   :  { %s145_s11 = scalar_lea.hbm %s232_s0, 16 }
   0x2   :  { %p146_p0 = scmp.ne.s32.totalorder %s232_s0, %s145_s11  ;;  %p149_p1 = scmp.lt.u32.totalorder %s145_s11, %s232_s0 }
   0x4   :  { %p151_p2 = pnand %p149_p1, %p146_p0 }
   0x6   :  { %154 = shalt.err (!%p151_p2)  }
   0x7   :  { %s181_s16 = smov [#allocation4]  }
   0x8   :  { %8 = dma.hbm_to_smem %s232_s0, 16, %s181_s16, [#allocation3] }
   0x9   :  { %177 = dma.done.wait [#allocation3], 16 }
   0xa   :  { %178 = vsyncadd [#allocation3], 4294967280 }
   0xb   :  { %10 = sfence }
   0xc   :  { %v18_v0 = vld [vmem:[%s233_s1] sm:$0x3] }
   0xd   :  { %11 = vsyncpa [#allocation6], 0  ;;  %s182_s21 = smov 1   ;;  %v19_v1 = vlaneseq  ;;  %s183_s22 = smov 2  }
   0xe   :  { %21 = vrot.lane.b32.xlu0 %v18_v0, %s182_s21  ;;  %s184_s0 = smov 4   ;;  %s185_s1 = smov 8  }
   0xf   :  { %v20_v2 = vand.u32 127, %v19_v1  ;;  %s186_s23 = smov 16   ;;  %s187_s24 = smov 32  }
  0x10   :  { %s188_s25 = smov 64   ;;  %s75_s26 = sld [smem:[#allocation4]] }
  0x11   :  { %vm23_vm0 = vcmp.ge.s32.totalorder %v20_v2, 1  ;;  %vm30_vm1 = vcmp.ge.s32.totalorder %v20_v2, 2  ;;  %vm37_vm2 = vcmp.ge.s32.totalorder %v20_v2, 4  ;;  %vm44_vm3 = vcmp.ge.s32.totalorder %v20_v2, 8  ;;  %s129_s27 = sld [smem:[#allocation4 + $0x1]]  ;;  %s130_s28 = sld [smem:[#allocation4 + $0x2]] }
  0x12   :  { %vm51_vm4 = vcmp.ge.s32.totalorder %v20_v2, 16  ;;  %vm58_vm5 = vcmp.ge.s32.totalorder %v20_v2, 32  ;;  %vm65_vm6 = vcmp.ge.s32.totalorder %v20_v2, 64  ;;  %s131_s29 = sld [smem:[#allocation4 + $0x3]]  ;;  %s132_s30 = sld [smem:[#allocation4 + $0x4]] }
  0x13   :  { %s133_s3 = sld [smem:[#allocation4 + $0x5]]  ;;  %s134_s4 = sld [smem:[#allocation4 + $0x6]] }
  0x14   :  { %s135_s5 = sld [smem:[#allocation4 + $0x7]]  ;;  %s189_s6 = smov [#allocation5]  }
  0x15   :  { %s120_s7 = sshll.u32 %s189_s6, 4  ;;  %s121_s7 = int_to_ptr.vmem [resolvable:$true] %s120_s7 }
  0x16   :  { %v76_v26 = vstv %s75_s26  ;;  %s155_s8 = scalar_lea.vmem %s121_s7, 256  ;;  %p160_p4 = scmp.lt.s32.totalorder %s121_s7, %s121_s7 }
  0x17   :  { %v81_v27 = vstv %s129_s27  ;;  %v86_v28 = vstv %s130_s28  ;;  %p156_p3 = scmp.ne.s32.totalorder %s121_s7, %s155_s8  ;;  %p161_p5 = scmp.lt.s32.totalorder %s155_s8, %s155_s8 }
  0x18   :  { %v91_v29 = vstv %s131_s29  ;;  %v96_v30 = vstv %s132_s30 }
  0x19   :  { %v101_v31 = vstv %s133_s3  ;;  %v106_v32 = vstv %s134_s4  ;;  %p162_p6 = por %p161_p5, %p160_p4 }
  0x1a   :  { %v111_v33 = vstv %s135_s5 }
  0x1b   :  { %p163_p7 = pnand %p162_p6, %p156_p3 }
  0x80   :  { %v22_v3 = vpop.permute.xlu0 %21 }
  0x81   :  { %v26_v4 = vsel %vm23_vm0, %v22_v3, 0.0 }
  0x82   :  { %v27_v5 = vadd.f32 %v26_v4, %v18_v0 }
  0x84   :  { %28 = vrot.lane.b32.xlu0 %v27_v5, %s183_s22 }
  0xf6   :  { %v29_v6 = vpop.permute.xlu0 %28 }
  0xf7   :  { %v33_v7 = vsel %vm30_vm1, %v29_v6, 0.0 }
  0xf8   :  { %v34_v8 = vadd.f32 %v33_v7, %v27_v5 }
  0xfa   :  { %35 = vrot.lane.b32.xlu1 %v34_v8, %s184_s0 }
 0x16c   :  { %v36_v9 = vpop.permute.xlu1 %35 }
 0x16d   :  { %v40_v10 = vsel %vm37_vm2, %v36_v9, 0.0 }
 0x16e   :  { %v41_v11 = vadd.f32 %v40_v10, %v34_v8 }
 0x170   :  { %42 = vrot.lane.b32.xlu1 %v41_v11, %s185_s1 }
 0x1e2   :  { %v43_v12 = vpop.permute.xlu1 %42 }
 0x1e3   :  { %v47_v13 = vsel %vm44_vm3, %v43_v12, 0.0 }
 0x1e4   :  { %v48_v14 = vadd.f32 %v47_v13, %v41_v11 }
 0x1e6   :  { %49 = vrot.lane.b32.xlu0 %v48_v14, %s186_s23 }
 0x258   :  { %v50_v15 = vpop.permute.xlu0 %49 }
 0x259   :  { %v54_v16 = vsel %vm51_vm4, %v50_v15, 0.0 }
 0x25a   :  { %v55_v17 = vadd.f32 %v54_v16, %v48_v14 }
 0x25c   :  { %56 = vrot.lane.b32.xlu1 %v55_v17, %s187_s24 }
 0x2ce   :  { %v57_v18 = vpop.permute.xlu1 %56 }
 0x2cf   :  { %v61_v19 = vsel %vm58_vm5, %v57_v18, 0.0 }
 0x2d0   :  { %v62_v20 = vadd.f32 %v61_v19, %v55_v17 }
 0x2d2   :  { %63 = vrot.lane.b32.xlu0 %v62_v20, %s188_s25 }
 0x344   :  { %v64_v21 = vpop.permute.xlu0 %63 }
 0x345   :  { %v68_v22 = vsel %vm65_vm6, %v64_v21, 0.0 }
 0x346   :  { %v69_v23 = vadd.f32 %v68_v22, %v62_v20 }
 0x348   :  { %v128_v24 = vadd.f32 -1.0, %v69_v23 }
 0x34a   :  { %v71_v25 = vmul.f32 %v128_v24, %v18_v0 }
 0x34c   :  { %72 = vst [vmem:[#allocation2] sm:$0x3] %v71_v25 }
 0x353   :  { %v73_v34 = vld [vmem:[#allocation2] sm:$0x3] }
 0x354   :  { %v77_v35 = vmul.f32 %v76_v26, %v73_v34  ;;  %v82_v36 = vmul.f32 %v81_v27, %v73_v34  ;;  %v87_v37 = vmul.f32 %v86_v28, %v73_v34  ;;  %v92_v38 = vmul.f32 %v91_v29, %v73_v34 }
 0x355   :  { %v97_v39 = vmul.f32 %v96_v30, %v73_v34  ;;  %v102_v40 = vmul.f32 %v101_v31, %v73_v34  ;;  %v107_v41 = vmul.f32 %v106_v32, %v73_v34  ;;  %v112_v42 = vmul.f32 %v111_v33, %v73_v34 }
 0x356   :  { %78 = vst [vmem:[#allocation5] sm:$0x3] %v77_v35  ;;  %83 = vst [vmem:[#allocation5 + $0x2] sm:$0x3] %v82_v36 }
 0x357   :  { %88 = vst [vmem:[#allocation5 + $0x4] sm:$0x3] %v87_v37  ;;  %93 = vst [vmem:[#allocation5 + $0x6] sm:$0x3] %v92_v38 }
 0x358   :  { %98 = vst [vmem:[#allocation5 + $0x8] sm:$0x3] %v97_v39  ;;  %103 = vst [vmem:[#allocation5 + $0xa] sm:$0x3] %v102_v40 }
 0x359   :  { %108 = vst [vmem:[#allocation5 + $0xc] sm:$0x3] %v107_v41  ;;  %113 = vst [vmem:[#allocation5 + $0xe] sm:$0x3] %v112_v42 }
 0x35a   :  { %166 = shalt.err (!%p163_p7)
}
 0x35b   :  { %s167_s11 = scalar_lea.hbm %s234_s2, 256 }
 0x35c   :  { %p168_p8 = scmp.ne.s32.totalorder %s234_s2, %s167_s11  ;;  %p171_p9 = scmp.lt.u32.totalorder %s167_s11, %s234_s2 }
 0x35e   :  { %p173_p10 = pnand %p171_p9, %p168_p8 }
 0x360   :  { %176 = shalt.err (!%p173_p10)
}
 0x361   :  { %123 = dma.vmem_to_hbm [thread:$0]  %s121_s7, 256, %s234_s2, [#allocation6]  }
 0x362   :  { %179 = dma.done.wait [#allocation6], 256  }
 0x363   :  { %180 = vsyncadd [#allocation6], 4294967040 }
 0x364   :  { %127 = vsyncpa [#allocation6], 1 }

</bundles_post_ra>
